<compile_context>
chip_gen: v6e
topology: v6e:2x2x1
jax: 0.10.0
libtpu: 0.0.40
codegen_flags: <defaults>
</compile_context>

<pallas_src>
import jax
import jax.numpy as jnp
from jax.experimental import pallas as pl
from jax.experimental.pallas import tpu as pltpu


def _make_kernel(B, H, A, gamma, inv_b):
    """Build the loss kernel with gamma and 1/B baked in as constants."""

    def kernel(x_ref,       # VMEM (2B, D) f32   [states ; next_states]
               w1_ref,      # VMEM (D, H)  f32
               w2_ref,      # VMEM (H, A)  f32
               bias_ref,    # VMEM (1, H+A) f32  [b1 | b2]
               side_ref,    # VMEM (B, 3)  f32   [actions | rewards | dead]
               out_ref):    # SMEM (1, 1)  f32   mean squared TD error
        b1 = bias_ref[:, :H]                      # (1, H)
        b2 = bias_ref[:, H:]                      # (1, A)

        # Fused forward pass: one (2B, D) @ (D, H) and one (2B, H) @ (H, A)
        # — each weight matrix is pushed through the MXU exactly once.
        h = jnp.maximum(
            jnp.dot(x_ref[...], w1_ref[...],
                    preferred_element_type=jnp.float32) + b1,
            0.0)                                                        # (2B, H)
        q = jnp.dot(h, w2_ref[...],
                    preferred_element_type=jnp.float32) + b2            # (2B, A)

        q0_actions = q[:B, :]      # (B, A)  target_model(states)
        q1_actions = q[B:, :]      # (B, A)  target_model(next_states)

        actions_i = side_ref[:, 0:1].astype(jnp.int32)                  # (B, 1)
        rewards   = side_ref[:, 1:2]                                    # (B, 1)
        dead      = side_ref[:, 2:3]                                    # (B, 1)

        # q0 = q0_actions[arange(B), actions] via select + lane reduce.
        col = jax.lax.broadcasted_iota(jnp.int32, (B, A), 1)
        q0 = jnp.sum(jnp.where(col == actions_i, q0_actions, 0.0),
                     axis=1, keepdims=True)                             # (B, 1)

        # q1 = max over action axis.
        q1 = jnp.max(q1_actions, axis=1, keepdims=True)                 # (B, 1)

        # discount_factor_tensor = where(dead, 0, gamma) == gamma * (1 - dead)
        disc = gamma * (1.0 - dead)                                     # (B, 1)

        td = rewards + disc * q1 - q0                                   # (B, 1)
        out_ref[0, 0] = jnp.sum(td * td) * inv_b

    return kernel


def reinforce_policy_loss(params, discount_factor, rewards, states, actions,
                          next_states, dead):
    """Pallas equivalent of ReinforcePolicy.forward(target_model, ...)."""
    w1, b1, w2, b2 = params
    B, _ = states.shape
    H = w1.shape[1]
    A = w2.shape[1]

    # Wrapper-side packing: 9 operands -> 5 (fewer DMA descriptors).
    x_stacked = jnp.concatenate([states, next_states], axis=0)          # (2B, D)
    biases = jnp.concatenate([b1, b2]).reshape(1, H + A)                # (1, H+A)
    side = jnp.stack([actions.astype(jnp.float32),
                      rewards.astype(jnp.float32),
                      dead.astype(jnp.float32)], axis=1)                # (B, 3)

    kernel = _make_kernel(B, H, A, float(discount_factor), 1.0 / float(B))

    vmem = pl.BlockSpec(memory_space=pltpu.MemorySpace.VMEM)
    smem = pl.BlockSpec(memory_space=pltpu.MemorySpace.SMEM)

    out = pl.pallas_call(
        kernel,
        out_shape=jax.ShapeDtypeStruct((1, 1), jnp.float32),
        in_specs=[vmem] * 5,
        out_specs=smem,
    )(x_stacked, w1, w2, biases, side)
    return out[0, 0]


def _reference(params, discount_factor, rewards, states, actions, next_states, dead):
    w1, b1, w2, b2 = params

    def model(x):
        return jnp.maximum(x @ w1 + b1, 0.0) @ w2 + b2

    q0 = model(states)[jnp.arange(actions.shape[0]), actions]
    q1 = jnp.max(model(next_states), axis=1)
    disc = jnp.where(dead, 0.0, jnp.float32(discount_factor))
    loss = rewards + disc * q1 - q0
    return jnp.mean(loss ** 2)


if __name__ == "__main__":
    B, D, H, A = 8, 16, 32, 8
    discount_factor = 0.99

    key = jax.random.PRNGKey(0)
    ks = jax.random.split(key, 8)

    # Deterministic target-model parameters (synthetic, not a checkpoint).
    w1 = jax.random.normal(ks[0], (D, H), jnp.float32) * 0.1
    b1 = jax.random.normal(ks[1], (H,), jnp.float32) * 0.1
    w2 = jax.random.normal(ks[2], (H, A), jnp.float32) * 0.1
    b2 = jax.random.normal(ks[3], (A,), jnp.float32) * 0.1
    params = (w1, b1, w2, b2)

    states = jax.random.normal(ks[4], (B, D), jnp.float32)
    next_states = jax.random.normal(ks[5], (B, D), jnp.float32)
    actions = jax.random.randint(ks[6], (B,), 0, A, jnp.int32)
    rewards = jax.random.normal(ks[7], (B,), jnp.float32)
    dead = jnp.array([False, True, False, False, True, False, False, False])

    loss = reinforce_policy_loss(params, discount_factor, rewards, states,
                                 actions, next_states, dead)
    loss = jax.block_until_ready(loss)

    ref = _reference(params, discount_factor, rewards, states, actions,
                     next_states, dead)
    assert jnp.allclose(loss, ref, atol=1e-5, rtol=1e-5), (loss, ref)

    print("KERNEL_OK")
</pallas_src>

<mosaic_0001>
module attributes {stable_mosaic.version = 11 : i64} {
  func.func @kernel(%arg0: memref<16x16xf32, #tpu.memory_space<vmem>>, %arg1: memref<16x32xf32, #tpu.memory_space<vmem>>, %arg2: memref<32x8xf32, #tpu.memory_space<vmem>>, %arg3: memref<1x40xf32, #tpu.memory_space<vmem>>, %arg4: memref<8x3xf32, #tpu.memory_space<vmem>>, %arg5: memref<1x1xf32, #tpu.memory_space<smem>>) attributes {dimension_semantics = [], scalar_prefetch = 0 : i64, scratch_operands = 0 : i64, tpu.core_type = #tpu.core_type<tc>} {
    %c0 = arith.constant 0 : index
    %c0_0 = arith.constant 0 : index
    %0 = vector.load %arg3[%c0, %c0_0] : memref<1x40xf32, #tpu.memory_space<vmem>>, vector<1x32xf32>
    %c0_1 = arith.constant 0 : index
    %c32 = arith.constant 32 : index
    %1 = vector.load %arg3[%c0_1, %c32] : memref<1x40xf32, #tpu.memory_space<vmem>>, vector<1x8xf32>
    %c0_2 = arith.constant 0 : index
    %c0_3 = arith.constant 0 : index
    %2 = vector.load %arg0[%c0_2, %c0_3] : memref<16x16xf32, #tpu.memory_space<vmem>>, vector<16x16xf32>
    %c0_4 = arith.constant 0 : index
    %c0_5 = arith.constant 0 : index
    %3 = vector.load %arg1[%c0_4, %c0_5] : memref<16x32xf32, #tpu.memory_space<vmem>>, vector<16x32xf32>
    %cst = arith.constant dense<0.000000e+00> : vector<16x32xf32>
    %4 = tpu.matmul %2, %3, %cst {dimension_numbers = #tpu.dot_dimension_numbers<[1], [0], [0], [1], [0, 0, 1, 1], [], []>} : vector<16x16xf32>, vector<16x32xf32>, vector<16x32xf32> -> vector<16x32xf32>
    %5 = vector.broadcast %0 : vector<1x32xf32> to vector<16x32xf32>
    %6 = arith.addf %4, %5 : vector<16x32xf32>
    %cst_6 = arith.constant 0.000000e+00 : f32
    %7 = vector.broadcast %cst_6 : f32 to vector<16x32xf32>
    %8 = arith.maximumf %6, %7 : vector<16x32xf32>
    %c0_7 = arith.constant 0 : index
    %c0_8 = arith.constant 0 : index
    %9 = vector.load %arg2[%c0_7, %c0_8] : memref<32x8xf32, #tpu.memory_space<vmem>>, vector<32x8xf32>
    %cst_9 = arith.constant dense<0.000000e+00> : vector<16x8xf32>
    %10 = tpu.matmul %8, %9, %cst_9 {dimension_numbers = #tpu.dot_dimension_numbers<[1], [0], [0], [1], [0, 0, 1, 1], [], []>} : vector<16x32xf32>, vector<32x8xf32>, vector<16x8xf32> -> vector<16x8xf32>
    %11 = vector.broadcast %1 : vector<1x8xf32> to vector<16x8xf32>
    %12 = arith.addf %10, %11 : vector<16x8xf32>
    %13 = vector.extract_strided_slice %12 {offsets = [0, 0], sizes = [8, 8], strides = [1, 1]} : vector<16x8xf32> to vector<8x8xf32>
    %14 = vector.extract_strided_slice %12 {offsets = [8, 0], sizes = [8, 8], strides = [1, 1]} : vector<16x8xf32> to vector<8x8xf32>
    %c0_10 = arith.constant 0 : index
    %c0_11 = arith.constant 0 : index
    %15 = vector.load %arg4[%c0_10, %c0_11] : memref<8x3xf32, #tpu.memory_space<vmem>>, vector<8x1xf32>
    %16 = arith.fptosi %15 : vector<8x1xf32> to vector<8x1xi32>
    %c0_12 = arith.constant 0 : index
    %c1 = arith.constant 1 : index
    %17 = vector.load %arg4[%c0_12, %c1] : memref<8x3xf32, #tpu.memory_space<vmem>>, vector<8x1xf32>
    %c0_13 = arith.constant 0 : index
    %c2 = arith.constant 2 : index
    %18 = vector.load %arg4[%c0_13, %c2] : memref<8x3xf32, #tpu.memory_space<vmem>>, vector<8x1xf32>
    %19 = tpu.iota {dimensions = array<i32: 1>} : vector<8x8xi32>
    %20 = vector.broadcast %16 : vector<8x1xi32> to vector<8x8xi32>
    %21 = arith.cmpi eq, %19, %20 : vector<8x8xi32>
    %cst_14 = arith.constant 0.000000e+00 : f32
    %22 = vector.broadcast %cst_14 : f32 to vector<8x8xf32>
    %23 = arith.select %21, %13, %22 : vector<8x8xi1>, vector<8x8xf32>
    %cst_15 = arith.constant dense<0.000000e+00> : vector<8xf32>
    %24 = vector.multi_reduction <add>, %23, %cst_15 [1] : vector<8x8xf32> to vector<8xf32>
    %25 = vector.shape_cast %24 : vector<8xf32> to vector<8x1xf32>
    %cst_16 = arith.constant dense<0xFF800000> : vector<8xf32>
    %26 = vector.multi_reduction <maximumf>, %14, %cst_16 [1] : vector<8x8xf32> to vector<8xf32>
    %27 = vector.shape_cast %26 : vector<8xf32> to vector<8x1xf32>
    %cst_17 = arith.constant 1.000000e+00 : f32
    %28 = vector.broadcast %cst_17 : f32 to vector<8x1xf32>
    %29 = arith.subf %28, %18 : vector<8x1xf32>
    %cst_18 = arith.constant 9.900000e-01 : f32
    %30 = vector.broadcast %cst_18 : f32 to vector<8x1xf32>
    %31 = arith.mulf %30, %29 : vector<8x1xf32>
    %32 = arith.mulf %31, %27 : vector<8x1xf32>
    %33 = arith.addf %17, %32 : vector<8x1xf32>
    %34 = arith.subf %33, %25 : vector<8x1xf32>
    %35 = arith.mulf %34, %34 : vector<8x1xf32>
    %36 = vector.shape_cast %35 : vector<8x1xf32> to vector<1x8x1xf32>
    %cst_19 = arith.constant dense<0.000000e+00> : vector<1xf32>
    %37 = vector.multi_reduction <add>, %36, %cst_19 [1, 2] : vector<1x8x1xf32> to vector<1xf32>
    %38 = vector.shape_cast %37 : vector<1xf32> to vector<1x1x1xf32>
    %39 = vector.extract %38[0, 0, 0] : f32 from vector<1x1x1xf32>
    %cst_20 = arith.constant 1.250000e-01 : f32
    %40 = arith.mulf %39, %cst_20 : f32
    %c0_21 = arith.constant 0 : index
    %c0_22 = arith.constant 0 : index
    %41 = memref.load %arg5[%c0_21, %c0_22] : memref<1x1xf32, #tpu.memory_space<smem>>
    memref.store %40, %arg5[%c0_21, %c0_22] : memref<1x1xf32, #tpu.memory_space<smem>>
    return
  }
}

</mosaic_0001>

<bundles_post_ra>
// kernel: tpu_custom_call.1
= control target key start
LH: loop header
LB: loop body
LE: loop exit
PB: predicated region body
PF: predicated region fallthrough
CT: control target
= control target key end

     0   :  { %vm32_vm0 = vcmask 130048   ;;  %s381_s0 = inlined_call_operand.vmem [shape: f32[16,16], index: 0, kind: input, shape index: {}]   ;;  %s382_s1 = inlined_call_operand.vmem [shape: f32[16,32], index: 1, kind: input, shape index: {}]   ;;  %s383_s2 = inlined_call_operand.vmem [shape: f32[32,8], index: 2, kind: input, shape index: {}]   ;;  %s384_s3 = inlined_call_operand.vmem [shape: f32[1,40], index: 3, kind: input, shape index: {}]   ;;  %s385_s4 = inlined_call_operand.vmem [shape: f32[8,3], index: 4, kind: input, shape index: {}]   ;;  %s386_s5 = inlined_call_operand.hbm [shape: f32[1,1], index: 5, kind: output, shape index: {}]  }
   0x1   :  { %v25_v0 = vld [vmem:[%s382_s1 + $0x8] sm:$0xff]  ;;  %v24_v1 = vld [vmem:[%s382_s1] sm:$0xff] }
   0x2   :  { %v22_v2 = vld [vmem:[%s381_s0] sm:$0xff]  ;;  %277 = vmatprep.subr.mxu0 %v25_v0 }
   0x3   :  { %281 = vmatprep.mubr.msk.f32.mxu0 %vm32_vm0, %v22_v2 }
   0x4   :  { %10 = vsyncpa [#allocation3], 0  ;;  %278 = vmatpush3.msra.mxu0 %v25_v0  ;;  %v23_v3 = vld [vmem:[%s381_s0 + $0x8] sm:$0xff]  ;;  %v119_v4 = vld [vmem:[%s383_s2 + $0x18] sm:$0xff]  ;;  %s314_s11 = smov 96   ;;  %v315_v11 = vmov 0   ;;  %v207_v20 = vlaneseq }
   0x5   :  { %279 = vmatprep.subr.mxu0 %v24_v1  ;;  %284 = vmatprep.subr.mxu1 %v119_v4  ;;  %v118_v5 = vld [vmem:[%s383_s2 + $0x10] sm:$0xff]  ;;  %v117_v6 = vld [vmem:[%s383_s2 + $0x8] sm:$0xff]  ;;  %v116_v7 = vld [vmem:[%s383_s2] sm:$0xff]  ;;  %vm123_vm1 = vcmask 261120   ;;  %vm214_vm2 = vcmask 64512   ;;  %s316_s2 = smov 127  }
   0x6   :  { %280 = vmatpush3.msra.mxu0 %v24_v1  ;;  %285 = vmatpush3.msra.mxu1 %v119_v4  ;;  %v262_v8 = vld [vmem:[%s384_s3] ss:$0 sm:$0xff]  ;;  %v208_v21 = vand.u32 127, %v207_v20  ;;  %vm235_vm4 = vcmask 7168   ;;  %s317_s12 = smov [#allocation2]  }
   0x7   :  { %282 = vmatmul.mubr.msk.f32.vlgmr.msra.gmra.mxu0 %vm32_vm0, %v23_v3  ;;  %286 = vmatprep.subr.mxu1 %v118_v5  ;;  %v205_v9 = vld [vmem:[%s385_s4] sm:$0xff] }
   0x8   :  { %287 = vmatpush3.msra.mxu1 %v118_v5  ;;  %120 = vrot.lane.b32.xlu0 %v262_v8, %s314_s11  ;;  %v295_v10 = vtrunc.f32 %v205_v9  ;;  %v221_v30 = vsub.f32 1.0, %v205_v9 }
   0x9   :  { %288 = vmatprep.subr.mxu1 %v117_v6  ;;  %303 = vset.pattern.permute.xlu0 %v315_v11 }
   0xa   :  { %289 = vmatpush3.msra.mxu1 %v117_v6  ;;  %v296_v12 = vcvt.f32.s32 %v295_v10  ;;  %v222_v31 = vmul.f32 0.99, %v221_v30 }
   0xb   :  { %290 = vmatprep.subr.mxu1 %v116_v7 }
   0xc   :  { %291 = vmatpush3.msra.mxu1 %v116_v7  ;;  %210 = vperm.xlu0 %303, %v296_v12  }
  0x7a   :  { %v121_v19 = vpop.permute.xlu0 %120 }
  0x87   :  { %v211_v22 = vpop.permute.xlu0 %210 }
  0x88   :  { %vm212_vm3 = vcmp.eq.s32.totalorder %v208_v21, %v211_v22 }
  0xc7   :  { %v283_v13 = vpop.f32.mrf.mxu0 }
  0xc8   :  { %v111_v14 = vadd.f32 %v283_v13, %v262_v8 }
  0xc9   :  { %v105_v15 = vpop.f32.mrf.mxu0 }
  0xca   :  { %v106_v16 = vadd.f32 %v262_v8, %v105_v15  ;;  %v115_v18 = vmax.f32 %v111_v14, 0.0 }
  0xcc   :  { %v114_v17 = vmax.f32 %v106_v16, 0.0 }
  0xce   :  { %292 = vmatprep.mubr.msk.f32.mxu1 %vm123_vm1, %v114_v17 }
  0xcf   :  { %293 = vmatmul.mubr.msk.f32.vlgmr.msra.gmra.mxu1 %vm123_vm1, %v115_v18 }
 0x18f   :  { %v294_v23 = vpop.f32.mrf.mxu1 }
 0x190   :  { %v202_v24 = vadd.f32 %v294_v23, %v121_v19 }
 0x191   :  { %v196_v25 = vpop.f32.mrf.mxu1 }
 0x192   :  { %v197_v26 = vadd.f32 %v196_v25, %v121_v19  ;;  %v218_v27 = vsel %vm214_vm2, %v202_v24, -inf }
 0x193   :  { %219 = vmax.xlane.f32.xlu1 %v218_v27 }
 0x194   :  { %v213_v28 = vsel %vm212_vm3, %v197_v26, 0.0 }
 0x195   :  { %v215_v29 = vsel %vm214_vm2, %v213_v28, 0.0 }
 0x197   :  { %216 = vadd.xlane.f32.xlu1 %v215_v29 }
 0x21c   :  { %v220_v32 = vpop.xlane.xlu1 %219 }
 0x21d   :  { %v223_v33 = vmul.f32 %v222_v31, %v220_v32 }
 0x21f   :  { %225 = vrot.lane.b32.xlu1 %v223_v33, %s316_s2 }
 0x220   :  { %v217_v34 = vpop.xlane.xlu1 %216 }
 0x291   :  { %v226_v35 = vpop.permute.xlu1 %225 }
 0x292   :  { %v228_v36 = vadd.f32 %v226_v35, %v205_v9 }
 0x294   :  { %v229_v37 = vsub.f32 %v228_v36, %v217_v34 }
 0x296   :  { %v230_v38 = vmul.f32 %v229_v37, %v229_v37 }
 0x298   :  { %232 = vrot.lane.b32.xlu0 %v230_v38, %s316_s2 }
 0x30a   :  { %v233_v39 = vpop.permute.xlu0 %232 }
 0x30b   :  { %v236_v40 = vsel %vm235_vm4, %v233_v39, 0.0 }
 0x30c   :  { %237 = vadd.xlane.f32.xlu0 %v236_v40 }
 0x395   :  { %v238_v41 = vpop.xlane.xlu0 %237 }
 0x396   :  { %v239_v42 = vrot.slane %v238_v41, 4 }
 0x398   :  { %v240_v43 = vadd.f32 %v239_v42, %v238_v41 }
 0x39a   :  { %v241_v44 = vrot.slane %v240_v43, 2 }
 0x39c   :  { %v242_v45 = vadd.f32 %v241_v44, %v240_v43 }
 0x39e   :  { %v243_v46 = vrot.slane %v242_v45, 1 }
 0x3a0   :  { %v244_v47 = vadd.f32 %v243_v46, %v242_v45 }
 0x3a2   :  { %297 = vpush %v244_v47 }
 0x3d3   :  { %s298_s3 = spop %297 }
 0x3d4   :  { %s246_s4 = smul.f32 0.125, %s298_s3 }
 0x3d6   :  { %248 = sst [smem:[#allocation2]] %s246_s4 }
 0x3d7   :  { %256 = dma.smem_to_hbm %s317_s12, 16, %s386_s5, [#allocation3]  }
 0x3d8   :  { %312 = dma.done.wait [#allocation3], 16  }
 0x3d9   :  { %313 = vsyncadd [#allocation3], 4294967280 }
 0x3da   :  { %260 = sfence }
 0x3db   :  { %261 = vsyncpa [#allocation3], 1 }

</bundles_post_ra>
